<compile_context>
chip_gen: v5e
topology: v5e:2x2
jax: 0.10.0
libtpu: 0.0.40
codegen_flags: <defaults>
</compile_context>

<pallas_src>
import jax
import jax.numpy as jnp
from jax.experimental import pallas as pl
from jax.experimental.pallas import tpu as pltpu


# ----------------------------------------------------------------------------
# Kernel: one (tm, tl) tile, pure pass-through copy.
# ----------------------------------------------------------------------------
def _identity_copy_kernel(x_ref, o_ref):
    o_ref[...] = x_ref[...]


# Candidate lane widths for the lane-dense relayout (largest divisor wins).
_LANE_WIDTHS = (2048, 1024, 512, 256, 128)

# ~2 MiB per block.  BlockSpec pipelining holds 2 input + 2 output buffers, so
# resident VMEM is ~4x this (~8 MiB): safely under v5e's 16 MiB default scoped
# limit and v7x's 32 MiB scoped / 64 MiB physical VMEM.
_TARGET_TILE_BYTES = 2 << 20


def _sublane_multiple(itemsize: int) -> int:
    # Native sublane packing: f32 -> 8, bf16/f16 -> 16, int8/fp8 -> 32.
    return {4: 8, 2: 16, 1: 32}.get(itemsize, 8)


def _materialized_identity_copy(x_past):
    """Tiled Pallas pass-through copy (only for when a fresh buffer / explicit
    op boundary is required; the identity itself needs no data movement)."""
    orig_shape = x_past.shape
    dtype = x_past.dtype
    itemsize = dtype.itemsize
    total = int(x_past.size)
    sub = _sublane_multiple(itemsize)

    # ---- Lane-dense relayout: last dim a large multiple of 128 if possible.
    lane = None
    for cand in _LANE_WIDTHS:
        if total % cand == 0:
            lane = cand
            break
    if lane is None:
        # No 128-multiple factorization of the element count: keep the natural
        # trailing dim (masked lanes only on edge tiles).
        lane = int(orig_shape[-1]) if len(orig_shape) > 0 else 1
        lane = max(lane, 1)
    rows = total // lane

    x2d = x_past.reshape(rows, lane)  # free relayout for contiguous data

    # ---- Byte-sized tiles (~2 MiB); ragged edge tiles are masked by Pallas.
    max_lane_elems = max(128, _TARGET_TILE_BYTES // (sub * itemsize))
    if lane <= max_lane_elems:
        tl = lane                                 # full lane extent
    else:
        tl = (max_lane_elems // 128) * 128        # 128-multiple partial tile

    tm_target = max(1, _TARGET_TILE_BYTES // (tl * itemsize))
    if tm_target >= rows or rows <= sub:
        tm = rows                                 # full sublane extent
    else:
        tm = max(sub, (tm_target // sub) * sub)   # sublane-multiple partial tile

    grid = (pl.cdiv(rows, tm), pl.cdiv(lane, tl))

    # Output aliases the (freshly created) 2D input buffer -> no second HBM
    # allocation.  Never donate the caller's own array object.
    aliases = {} if x2d is x_past else {0: 0}

    out2d = pl.pallas_call(
        _identity_copy_kernel,
        out_shape=jax.ShapeDtypeStruct((rows, lane), dtype),
        grid=grid,
        in_specs=[pl.BlockSpec((tm, tl), lambda i, j: (i, j))],
        out_specs=pl.BlockSpec((tm, tl), lambda i, j: (i, j)),
        input_output_aliases=aliases,
        compiler_params=pltpu.CompilerParams(
            dimension_semantics=("parallel", "parallel")),
    )(x2d)
    return out2d.reshape(orig_shape)


def identity_flat_encoder_forward(x_past, *, force_materialize: bool = False):
    """Forward of IdentityFlatEncoderModule: returns x_past.

    Default path returns the input directly (no pallas_call, zero HBM
    traffic) — for an identity this beats any copy on every TPU generation,
    and it also covers the small-input bypass.  Pass force_materialize=True
    to stream through the tiled Pallas pass-through copy instead (useful only
    when an explicit op boundary / fresh HBM buffer is required).
    """
    if not force_materialize:
        return x_past
    if x_past.size == 0:
        return x_past
    return _materialized_identity_copy(x_past)


# ----------------------------------------------------------------------------
if __name__ == "__main__":
    # Shapes consistent with the flat-encoder usage:
    # x_past is (batch, n_series, window_size + forecasting_horizon).
    window_size = 16
    forecasting_horizon = 8
    B, C = 2, 4
    T = window_size + forecasting_horizon

    key = jax.random.PRNGKey(0)
    x_past = jax.random.normal(key, (B, C, T), jnp.float32)

    # 1) Default path: identity with zero data movement.
    out_fast = jax.block_until_ready(identity_flat_encoder_forward(x_past))
    assert out_fast.shape == x_past.shape and out_fast.dtype == x_past.dtype
    assert jnp.array_equal(out_fast, x_past), "identity (direct) mismatch"

    # 2) Forced-materialization path: runs the Pallas pass-through kernel
    #    (fallback layout, total elements not a multiple of 128).
    out_kernel = identity_flat_encoder_forward(x_past, force_materialize=True)
    out_kernel = jax.block_until_ready(out_kernel)
    assert out_kernel.shape == x_past.shape and out_kernel.dtype == x_past.dtype
    assert jnp.array_equal(out_kernel, x_past), "identity (pallas) mismatch"

    # 3) Lane-dense branch: element count divisible by 128 exercises the
    #    128-multiple relayout path of the kernel.
    x2 = jax.random.normal(jax.random.PRNGKey(1), (2, 4, 128), jnp.float32)
    out2 = jax.block_until_ready(
        identity_flat_encoder_forward(x2, force_materialize=True))
    assert jnp.array_equal(out2, x2), "identity (lane-dense pallas) mismatch"

    print("KERNEL_OK")
</pallas_src>

<mosaic_0001>
module attributes {stable_mosaic.version = 11 : i64} {
  func.func @_identity_copy_kernel(%arg0: i32, %arg1: i32, %arg2: memref<8x24xf32, #tpu.memory_space<vmem>>, %arg3: memref<8x24xf32, #tpu.memory_space<vmem>>) attributes {dimension_semantics = [#tpu.dimension_semantics<parallel>, #tpu.dimension_semantics<parallel>], iteration_bounds = array<i64: 1, 1>, scalar_prefetch = 0 : i64, scratch_operands = 0 : i64, tpu.core_type = #tpu.core_type<tc>, window_params = [{transform_indices = @transform_0, window_bounds = array<i64: 8, 24>}, {transform_indices = @transform_1, window_bounds = array<i64: 8, 24>}]} {
    %c0 = arith.constant 0 : index
    %c0_0 = arith.constant 0 : index
    %0 = vector.load %arg2[%c0, %c0_0] : memref<8x24xf32, #tpu.memory_space<vmem>>, vector<8x24xf32>
    %c0_1 = arith.constant 0 : index
    %c0_2 = arith.constant 0 : index
    %1 = vector.load %arg3[%c0_1, %c0_2] : memref<8x24xf32, #tpu.memory_space<vmem>>, vector<8x24xf32>
    tpu.vector_store %arg3[%c0_1, %c0_2], %0 {strides = array<i32>} : memref<8x24xf32, #tpu.memory_space<vmem>>, vector<8x24xf32>,
    return
  }
  func.func @transform_0(%arg0: i32, %arg1: i32) -> (i32, i32) {
    %c0_i32 = arith.constant 0 : i32
    return %arg0, %arg1 : i32, i32
  }
  func.func @transform_1(%arg0: i32, %arg1: i32) -> (i32, i32) {
    %c0_i32 = arith.constant 0 : i32
    return %arg0, %arg1 : i32, i32
  }
}

</mosaic_0001>

<bundles_post_ra>
// kernel: tpu_custom_call.1
= control target key start
LH: loop header
LB: loop body
LE: loop exit
PB: predicated region body
PF: predicated region fallthrough
CT: control target
= control target key end

     0   :  { %6 = vsyncpa [#allocation3], 0  ;;  %s115_s0 = inlined_call_operand.hbm [shape: f32[8,24], index: 0, kind: input, shape index: {}, may-alias: {0,1}]   ;;  %s116_s1 = inlined_call_operand.hbm [shape: f32[8,24], index: 1, kind: output, shape index: {}, may-alias: {0,1}]  }
   0x1   :  { %7 = vsyncpa [#allocation4], 0  ;;  %s13_s8 = sshll.u32 %s115_s0, 4  ;;  %s97_s9 = smov [#allocation2]   ;;  %s14_s8 = int_to_ptr.hbm [resolvable:$true] %s13_s8 }
   0x2   :  { %s15_s10 = sshll.u32 %s97_s9, 4  ;;  %s16_s10 = int_to_ptr.vmem [resolvable:$true] %s15_s10 }
   0x3   :  { %18 = dma.hbm_to_vmem [thread:$0]  %s14_s8, 128, %s16_s10, [#allocation3]  }
   0x4   :  { %93 = dma.done.wait [#allocation3], 128  }
   0x5   :  { %94 = vsyncadd [#allocation3], 4294967168  ;;  %s98_s11 = smov [#allocation5]   ;;  %s33_s15 = sshll.u32 %s116_s1, 4  ;;  %vm24_vm0 = vcmask 195584   ;;  %v23_v0 = vld [vmem:[#allocation2] sm:$0xff]  ;;  %s34_s15 = int_to_ptr.hbm [resolvable:$true] %s33_s15 }
   0x6   :  { %s31_s12 = sshll.u32 %s98_s11, 4  ;;  %25 = vst.msk [vmem:[#allocation5] sm:$0xff] %vm24_vm0, %v23_v0  ;;  %s32_s12 = int_to_ptr.vmem [resolvable:$true] %s31_s12 }
   0x7   :  { %36 = dma.vmem_to_hbm [thread:$0]  %s32_s12, 128, %s34_s15, [#allocation4]  }
   0x8   :  { %95 = dma.done.wait [#allocation4], 128  }
   0x9   :  { %96 = vsyncadd [#allocation4], 4294967168 }
   0xa   :  { %41 = vsyncpa [#allocation3], 1 }
   0xb   :  { %42 = vsyncpa [#allocation4], 1 }

</bundles_post_ra>
